<compile_context>
chip_gen: v7x
topology: tpu7x:2x2x1
jax: 0.10.0
libtpu: 0.0.40
codegen_flags: <defaults>
</compile_context>

<pallas_src>
import functools

import jax
import jax.numpy as jnp
from jax.experimental import pallas as pl
from jax.experimental.pallas import tpu as pltpu


def _layernorm_kernel(x_ref, gamma_ref, beta_ref, o_ref, *, eps):
    # x_ref: (ROW_TILE, H), gamma_ref/beta_ref: (1, H)
    x = x_ref[...].astype(jnp.float32)
    g = gamma_ref[...].astype(jnp.float32)
    b = beta_ref[...].astype(jnp.float32)

    mean = jnp.mean(x, axis=-1, keepdims=True)
    centered = x - mean
    var = jnp.mean(centered * centered, axis=-1, keepdims=True)
    inv_std = jax.lax.rsqrt(var + eps)

    # gamma * ((x - mean) * inv_std) + beta  ==  centered * (inv_std * g) + b
    o_ref[...] = (centered * (inv_std * g) + b).astype(o_ref.dtype)


def _sublane_packing(dtype):
    # f32 -> 8, bf16/f16 -> 16, int8/fp8 -> 32 rows per vreg sublane group.
    itemsize = jnp.dtype(dtype).itemsize
    return max(8, 32 // max(itemsize, 1))


def _pick_row_tile(rows, hidden, dtype, *, target_bytes=2 << 20, max_rows=1024):
    """Pick a row tile: ~target_bytes of input per block, packing-aligned."""
    pack = _sublane_packing(dtype)
    itemsize = jnp.dtype(dtype).itemsize

    t = target_bytes // max(hidden * itemsize, 1)
    t = max(pack, (t // pack) * pack)
    t = min(t, max_rows)

    # Don't exceed the row count (rounded to packing); keeps tiny inputs sane.
    rows_cap = max(pack, (rows // pack) * pack)
    t = min(t, rows_cap)

    # Keep a handful of grid steps so megacore (v7x, 2 TCs) has work to split,
    # as long as the input is big enough for that to matter.
    min_steps = 4
    if rows >= min_steps * pack and pl.cdiv(rows, t) < min_steps:
        t = max(pack, ((rows // min_steps) // pack) * pack)

    return t


def layer_norm(x, gamma, beta, *, eps=1e-5, row_tile=None):
    """LayerNorm over the last axis. x: (..., H); gamma, beta: (H,)."""
    orig_shape = x.shape
    H = orig_shape[-1]
    rows = 1
    for d in orig_shape[:-1]:
        rows *= d
    x2 = x.reshape(rows, H)

    if row_tile is None:
        row_tile = _pick_row_tile(rows, H, x.dtype)

    gamma2 = gamma.reshape(1, H)
    beta2 = beta.reshape(1, H)

    grid = (pl.cdiv(rows, row_tile),)

    # VMEM budget: in + out double-buffered, plus f32 working set in-kernel.
    itemsize = jnp.dtype(x.dtype).itemsize
    block_bytes = row_tile * H * itemsize
    vmem_est = 4 * block_bytes + 4 * row_tile * H * 4 + 4 * H * 4
    vmem_limit = int(min(max(vmem_est + (4 << 20), 32 << 20), 48 << 20))

    out = pl.pallas_call(
        functools.partial(_layernorm_kernel, eps=eps),
        out_shape=jax.ShapeDtypeStruct((rows, H), x.dtype),
        grid_spec=pltpu.PrefetchScalarGridSpec(
            num_scalar_prefetch=0,
            grid=grid,
            in_specs=[
                pl.BlockSpec((row_tile, H), lambda i: (i, 0)),
                pl.BlockSpec((1, H), lambda i: (0, 0)),
                pl.BlockSpec((1, H), lambda i: (0, 0)),
            ],
            out_specs=pl.BlockSpec((row_tile, H), lambda i: (i, 0)),
        ),
        compiler_params=pltpu.CompilerParams(
            dimension_semantics=("parallel",),
            vmem_limit_bytes=vmem_limit,
        ),
    )(x2, gamma2, beta2)

    return out.reshape(orig_shape)


def _reference(x, gamma, beta, eps):
    mean = jnp.mean(x.astype(jnp.float32), axis=-1, keepdims=True)
    var = jnp.mean((x.astype(jnp.float32) - mean) ** 2, axis=-1, keepdims=True)
    y = (x.astype(jnp.float32) - mean) / jnp.sqrt(var + eps)
    return (gamma.astype(jnp.float32) * y + beta.astype(jnp.float32)).astype(x.dtype)


if __name__ == "__main__":
    eps = 1e-5
    key = jax.random.PRNGKey(0)

    # Shapes consistent with the module: parameter_shape = (hidden,)
    batch, seq, hidden = 2, 8, 32
    x = jax.random.normal(key, (batch, seq, hidden), dtype=jnp.float32)
    gamma = jnp.ones((hidden,), dtype=jnp.float32)   # nn.Parameter(torch.ones)
    beta = jnp.zeros((hidden,), dtype=jnp.float32)   # nn.Parameter(torch.zeros)

    out = layer_norm(x, gamma, beta, eps=eps)
    out = jax.block_until_ready(out)
    ref = _reference(x, gamma, beta, eps)
    assert out.shape == x.shape and out.dtype == x.dtype
    assert jnp.allclose(out, ref, atol=1e-5, rtol=1e-5)

    # Extra check: non-divisible row count exercises the ragged last block
    # (no pad / slice copies in the wrapper anymore).
    key2 = jax.random.PRNGKey(1)
    x2 = jax.random.normal(key2, (3, 5, hidden), dtype=jnp.float32)
    out2 = jax.block_until_ready(layer_norm(x2, gamma, beta, eps=eps))
    ref2 = _reference(x2, gamma, beta, eps)
    assert jnp.allclose(out2, ref2, atol=1e-5, rtol=1e-5)

    print("KERNEL_OK")
</pallas_src>

<mosaic_0001>
module attributes {stable_mosaic.version = 11 : i64} {
  func.func @_layernorm_kernel(%arg0: i32, %arg1: memref<16x32xf32, #tpu.memory_space<vmem>>, %arg2: memref<1x32xf32, #tpu.memory_space<vmem>>, %arg3: memref<1x32xf32, #tpu.memory_space<vmem>>, %arg4: memref<16x32xf32, #tpu.memory_space<vmem>>) attributes {dimension_semantics = [#tpu.dimension_semantics<parallel>], iteration_bounds = array<i64: 1>, scalar_prefetch = 0 : i64, scratch_operands = 0 : i64, tpu.core_type = #tpu.core_type<tc>, window_params = [{transform_indices = @transform_0, window_bounds = array<i64: 16, 32>}, {pipeline_mode = #tpu.pipeline_mode<synchronous>, transform_indices = @transform_1, window_bounds = array<i64: 1, 32>}, {pipeline_mode = #tpu.pipeline_mode<synchronous>, transform_indices = @transform_2, window_bounds = array<i64: 1, 32>}, {transform_indices = @transform_3, window_bounds = array<i64: 16, 32>}]} {
    %c0 = arith.constant 0 : index
    %c0_0 = arith.constant 0 : index
    %0 = vector.load %arg1[%c0, %c0_0] : memref<16x32xf32, #tpu.memory_space<vmem>>, vector<16x32xf32>
    %c0_1 = arith.constant 0 : index
    %c0_2 = arith.constant 0 : index
    %1 = vector.load %arg2[%c0_1, %c0_2] : memref<1x32xf32, #tpu.memory_space<vmem>>, vector<1x32xf32>
    %c0_3 = arith.constant 0 : index
    %c0_4 = arith.constant 0 : index
    %2 = vector.load %arg3[%c0_3, %c0_4] : memref<1x32xf32, #tpu.memory_space<vmem>>, vector<1x32xf32>
    %cst = arith.constant dense<0.000000e+00> : vector<16xf32>
    %3 = vector.multi_reduction <add>, %0, %cst [1] : vector<16x32xf32> to vector<16xf32>
    %4 = vector.shape_cast %3 : vector<16xf32> to vector<16x1xf32>
    %cst_5 = arith.constant 3.200000e+01 : f32
    %5 = vector.broadcast %cst_5 : f32 to vector<16x1xf32>
    %6 = arith.divf %4, %5 : vector<16x1xf32>
    %7 = vector.broadcast %6 : vector<16x1xf32> to vector<16x32xf32>
    %8 = arith.subf %0, %7 : vector<16x32xf32>
    %9 = arith.mulf %8, %8 : vector<16x32xf32>
    %cst_6 = arith.constant dense<0.000000e+00> : vector<16xf32>
    %10 = vector.multi_reduction <add>, %9, %cst_6 [1] : vector<16x32xf32> to vector<16xf32>
    %11 = vector.shape_cast %10 : vector<16xf32> to vector<16x1xf32>
    %cst_7 = arith.constant 3.200000e+01 : f32
    %12 = vector.broadcast %cst_7 : f32 to vector<16x1xf32>
    %13 = arith.divf %11, %12 : vector<16x1xf32>
    %cst_8 = arith.constant 9.99999974E-6 : f32
    %14 = vector.broadcast %cst_8 : f32 to vector<16x1xf32>
    %15 = arith.addf %13, %14 : vector<16x1xf32>
    %16 = math.rsqrt %15 : vector<16x1xf32>
    %17 = vector.broadcast %16 : vector<16x1xf32> to vector<16x32xf32>
    %18 = vector.broadcast %1 : vector<1x32xf32> to vector<16x32xf32>
    %19 = arith.mulf %17, %18 : vector<16x32xf32>
    %20 = arith.mulf %8, %19 : vector<16x32xf32>
    %21 = vector.broadcast %2 : vector<1x32xf32> to vector<16x32xf32>
    %22 = arith.addf %20, %21 : vector<16x32xf32>
    %c0_9 = arith.constant 0 : index
    %c0_10 = arith.constant 0 : index
    %23 = vector.load %arg4[%c0_9, %c0_10] : memref<16x32xf32, #tpu.memory_space<vmem>>, vector<16x32xf32>
    tpu.vector_store %arg4[%c0_9, %c0_10], %22 {strides = array<i32>} : memref<16x32xf32, #tpu.memory_space<vmem>>, vector<16x32xf32>,
    return
  }
  func.func @transform_0(%arg0: i32) -> (i32, i32) {
    %c0_i32 = arith.constant 0 : i32
    %c0_i32_0 = arith.constant 0 : i32
    return %arg0, %c0_i32 : i32, i32
  }
  func.func @transform_1(%arg0: i32) -> (i32, i32) {
    %c0_i32 = arith.constant 0 : i32
    %c0_i32_0 = arith.constant 0 : i32
    %c0_i32_1 = arith.constant 0 : i32
    return %c0_i32, %c0_i32_0 : i32, i32
  }
  func.func @transform_2(%arg0: i32) -> (i32, i32) {
    %c0_i32 = arith.constant 0 : i32
    %c0_i32_0 = arith.constant 0 : i32
    %c0_i32_1 = arith.constant 0 : i32
    return %c0_i32, %c0_i32_0 : i32, i32
  }
  func.func @transform_3(%arg0: i32) -> (i32, i32) {
    %c0_i32 = arith.constant 0 : i32
    %c0_i32_0 = arith.constant 0 : i32
    return %arg0, %c0_i32 : i32, i32
  }
}

</mosaic_0001>

<bundles_post_ra>
// kernel: tpu_custom_call.1
= control target key start
LH: loop header
LB: loop body
LE: loop exit
PB: predicated region body
PF: predicated region fallthrough
CT: control target
= control target key end

     0   :  { %8 = vsyncpa [#allocation3], 0  ;;  %s220_s0 = inlined_call_operand.hbm [shape: f32[16,32], index: 0, kind: input, shape index: {}]   ;;  %s221_s1 = inlined_call_operand.vmem [shape: f32[1,32], index: 1, kind: input, shape index: {}]   ;;  %s222_s2 = inlined_call_operand.vmem [shape: f32[1,32], index: 2, kind: input, shape index: {}]   ;;  %s223_s3 = inlined_call_operand.hbm [shape: f32[16,32], index: 3, kind: output, shape index: {}]  }
   0x1   :  { %9 = vsyncpa [#allocation4], 0  ;;  %s154_s12 = smov [#allocation2]   ;;  %s106_s16 = scalar_lea.hbm %s220_s0, 256 }
   0x2   :  { %s15_s13 = sshll.u32 %s154_s12, 4  ;;  %p107_p0 = scmp.ne.s32.totalorder %s220_s0, %s106_s16  ;;  %s16_s13 = int_to_ptr.vmem [resolvable:$true] %s15_s13 }
   0x3   :  { %p110_p1 = scmp.lt.u32.totalorder %s106_s16, %s220_s0 }
   0x5   :  { %p112_p2 = pnand %p110_p1, %p107_p0 }
   0x7   :  { %115 = shalt.err (!%p112_p2)
}
   0x8   :  { %s116_s21 = scalar_lea.vmem %s16_s13, 256  ;;  %p121_p4 = scmp.lt.s32.totalorder %s16_s13, %s16_s13 }
   0x9   :  { %p117_p3 = scmp.ne.s32.totalorder %s16_s13, %s116_s21  ;;  %p122_p5 = scmp.lt.s32.totalorder %s116_s21, %s116_s21 }
   0xb   :  { %p123_p6 = por %p122_p5, %p121_p4 }
   0xd   :  { %p124_p7 = pnand %p123_p6, %p117_p3 }
   0xf   :  { %127 = shalt.err (!%p124_p7)
}
  0x10   :  { %s155_s22 = smov 128   ;;  %s156_s23 = smov 8  }
  0x11   :  { %21 = dma.hbm_to_vmem [thread:$0]  %s220_s0, 256, %s16_s13, [#allocation3], %s155_s22, %s155_s22, %s156_s23  }
  0x12   :  { %150 = dma.done.wait [#allocation3], 256  }
  0x13   :  { %151 = vsyncadd [#allocation3], 4294967040  ;;  %vm33_vm0 = vcmask 261120   ;;  %v29_v0 = vld [vmem:[#allocation2] sm:$0xff]  ;;  %v30_v1 = vld [vmem:[#allocation2 + $0x8] sm:$0xff]  ;;  %s157_s29 = smov [#allocation5]  }
  0x14   :  { %v34_v2 = vsel %vm33_vm0, %v29_v0, 0.0  ;;  %v37_v3 = vsel %vm33_vm0, %v30_v1, 0.0  ;;  %v96_v20 = vld [vmem:[%s221_s1] ss:$0 sm:$0xff]  ;;  %s84_s30 = sshll.u32 %s157_s29, 4  ;;  %s85_s30 = int_to_ptr.vmem [resolvable:$true] %s84_s30 }
  0x15   :  { %35 = vadd.xlane.f32.xlu0 %v34_v2  ;;  %v97_v23 = vld [vmem:[%s222_s2] ss:$0 sm:$0xff]  ;;  %s128_s1 = scalar_lea.vmem %s85_s30, 256  ;;  %p133_p9 = scmp.lt.s32.totalorder %s85_s30, %s85_s30 }
  0x16   :  { %p129_p8 = scmp.ne.s32.totalorder %s85_s30, %s128_s1  ;;  %p134_p10 = scmp.lt.s32.totalorder %s128_s1, %s128_s1 }
  0x18   :  { %p135_p11 = por %p134_p10, %p133_p9 }
  0x19   :  { %38 = vadd.xlane.f32.xlu0 %v37_v3 }
  0x1a   :  { %p136_p12 = pnand %p135_p11, %p129_p8 }
  0xa2   :  { %v36_v4 = vpop.xlane.xlu0 %35 }
  0xa3   :  { %v41_v5 = vmul.f32 0.03125, %v36_v4 }
  0xa5   :  { %v43_v6 = vsub.f32 %v29_v0, %v41_v5 }
  0xa6   :  { %v39_v7 = vpop.xlane.xlu0 %38 }
  0xa7   :  { %v42_v8 = vmul.f32 0.03125, %v39_v7  ;;  %v45_v9 = vmul.f32 %v43_v6, %v43_v6 }
  0xa9   :  { %v44_v10 = vsub.f32 %v30_v1, %v42_v8  ;;  %v47_v11 = vsel %vm33_vm0, %v45_v9, 0.0 }
  0xaa   :  { %48 = vadd.xlane.f32.xlu1 %v47_v11 }
  0xab   :  { %v46_v12 = vmul.f32 %v44_v10, %v44_v10 }
  0xad   :  { %v50_v13 = vsel %vm33_vm0, %v46_v12, 0.0 }
  0xae   :  { %51 = vadd.xlane.f32.xlu1 %v50_v13 }
 0x137   :  { %v49_v14 = vpop.xlane.xlu1 %48 }
 0x138   :  { %v53_v15 = vmul.f32 0.03125, %v49_v14 }
 0x13a   :  { %v55_v16 = vadd.f32 1e-05, %v53_v15 }
 0x13b   :  { %v52_v17 = vpop.xlane.xlu1 %51 }
 0x13c   :  { %102 = vrsqrt.f32 %v55_v16  ;;  %v54_v18 = vmul.f32 0.03125, %v52_v17 }
 0x13e   :  { %v56_v19 = vadd.f32 1e-05, %v54_v18 }
 0x140   :  { %104 = vrsqrt.f32 %v56_v19 }
 0x146   :  { %v103_v21 = vpop.eup %102 }
 0x147   :  { %v65_v22 = vmul.f32 %v103_v21, %v96_v20 }
 0x149   :  { %v67_v24 = vmul.f32 %v65_v22, %v43_v6 }
 0x14a   :  { %v105_v25 = vpop.eup %104 }
 0x14b   :  { %v66_v26 = vmul.f32 %v105_v25, %v96_v20  ;;  %v75_v27 = vadd.f32 %v97_v23, %v67_v24 }
 0x14d   :  { %v68_v28 = vmul.f32 %v66_v26, %v44_v10  ;;  %77 = vst.msk [vmem:[#allocation5] sm:$0xff] %vm33_vm0, %v75_v27 }
 0x14f   :  { %v76_v29 = vadd.f32 %v97_v23, %v68_v28 }
 0x151   :  { %78 = vst.msk [vmem:[#allocation5 + $0x8] sm:$0xff] %vm33_vm0, %v76_v29 }
 0x152   :  { %139 = shalt.err (!%p136_p12)
}
 0x153   :  { %s140_s5 = scalar_lea.hbm %s223_s3, 256 }
 0x154   :  { %p141_p13 = scmp.ne.s32.totalorder %s223_s3, %s140_s5  ;;  %p144_p0 = scmp.lt.u32.totalorder %s140_s5, %s223_s3 }
 0x156   :  { %p146_p1 = pnand %p144_p0, %p141_p13 }
 0x158   :  { %149 = shalt.err (!%p146_p1)
}
 0x159   :  { %90 = dma.vmem_to_hbm [thread:$0]  %s85_s30, 256, %s223_s3, [#allocation4], %s155_s22, %s155_s22, %s156_s23  }
 0x15a   :  { %152 = dma.done.wait [#allocation4], 256  }
 0x15b   :  { %153 = vsyncadd [#allocation4], 4294967040 }
 0x15c   :  { %94 = vsyncpa [#allocation3], 1 }
 0x15d   :  { %95 = vsyncpa [#allocation4], 1 }

</bundles_post_ra>
